<compile_context>
chip_gen: v7x
topology: tpu7x:2x2x1
jax: 0.10.0
libtpu: 0.0.40
codegen_flags: <defaults>
</compile_context>

<pallas_src>
import functools

import numpy as np

import jax
import jax.numpy as jnp
from jax.experimental import pallas as pl
from jax.experimental.pallas import tpu as pltpu


# --------------------------------------------------------------------------
# Fused conv3x3(pad=1) [+ optional fused BN-apply+ReLU of the previous stage]
# + BN batch-statistics accumulation.  Lane-dense (.., W*C) layout throughout.
# --------------------------------------------------------------------------
def _conv3x3_bn_stats_kernel(x_ref, w_ref, scale_ref, shift_ref,
                             out_ref, stats_ref, pad_ref, stats_acc,
                             *, apply_pre_act, nb, H, W, C_in, C_out):
    n = pl.program_id(0)
    WC_in = W * C_in
    WC_out = W * C_out

    @pl.when(n == 0)
    def _():
        # Zero the scratch / stats accumulator exactly once: the interior rows
        # are rewritten every step, the top/bottom zero-pad rows never change.
        pad_ref[...] = jnp.zeros_like(pad_ref)
        stats_acc[...] = jnp.zeros_like(stats_acc)

    # Load activations (lane-dense (nb, H, W*C_in)); optionally apply the
    # previous stage's BatchNorm + ReLU while loading (saves a full HBM pass).
    # Elementwise math stays f32 (v5e has no bf16 VPU); the scratch is bf16.
    x = x_ref[...].astype(jnp.float32)
    if apply_pre_act:
        scale = scale_ref[...].reshape(1, 1, WC_in)
        shift = shift_ref[...].reshape(1, 1, WC_in)
        x = jnp.maximum(x * scale + shift, 0.0)
    # Lane-aligned interior write (rows 1..H); width zero-padding is folded
    # into the Toeplitz weights so no lane-offset border is needed.
    pad_ref[:, 1:H + 1, :] = x.astype(jnp.bfloat16)

    # 3x3 conv as 3 row-Toeplitz matmuls on the MXU, f32 accumulation:
    #   (nb*H, W*C_in) x (W*C_in, W*C_out)  for dy in {0,1,2}.
    # The dy views are plain row offsets of the padded scratch.
    acc = jnp.zeros((nb * H, WC_out), jnp.float32)
    for dy in range(3):
        a = pad_ref[:, dy:dy + H, :].reshape(nb * H, WC_in)
        acc = acc + jnp.dot(a, w_ref[dy], preferred_element_type=jnp.float32)

    # Lane-dense (last dim = W*C_out = 128) unmasked output store.
    out_ref[...] = acc.reshape(nb, H, WC_out).astype(out_ref.dtype)

    # BN batch statistics: per-lane sum / sum-of-squares accumulated in a VMEM
    # scratch; the (W, C_out) lane-group reduction + mean/var finalize happen
    # in the JAX wrapper.
    stats_acc[0:1, :] += jnp.sum(acc, axis=0, keepdims=True)
    stats_acc[1:2, :] += jnp.sum(acc * acc, axis=0, keepdims=True)

    @pl.when(n == pl.num_programs(0) - 1)
    def _():
        stats_ref[...] = stats_acc[...]        # written exactly once


def conv3x3_bn_stats(x_ld, w_toe, scale_t, shift_t, *, apply_pre_act,
                     H, W, C_in, C_out, out_dtype):
    """x_ld: (N, H, W*C_in).  w_toe: (3, W*C_in, W*C_out) bf16 Toeplitz weights.
    scale_t/shift_t: (1, W*C_in) f32 (previous-stage BN, channel-tiled)."""
    N = x_ld.shape[0]
    WC_in, WC_out = W * C_in, W * C_out

    # Batch-block size: as many images per grid step as fit a conservative
    # working-set budget (taller M per MXU push, fewer grid steps, bigger
    # DMAs).  Budget sized so double-buffered tiles fit v7x's 64 MiB VMEM;
    # v5e/v6e (128 MiB) could go larger (raise vmem_limit_bytes when scaling).
    budget = 24 * 1024 * 1024
    nb = 1
    for cand in range(N, 0, -1):
        if N % cand:
            continue
        step_bytes = (cand * H * WC_in * 4            # input block
                      + cand * (H + 2) * WC_in * 2    # bf16 padded scratch
                      + 2 * cand * H * WC_out * 4)    # f32 acc + output block
        if 2 * step_bytes <= budget:
            nb = cand
            break

    kernel = functools.partial(
        _conv3x3_bn_stats_kernel, apply_pre_act=apply_pre_act,
        nb=nb, H=H, W=W, C_in=C_in, C_out=C_out)

    return pl.pallas_call(
        kernel,
        out_shape=(jax.ShapeDtypeStruct((N, H, WC_out), out_dtype),
                   jax.ShapeDtypeStruct((2, WC_out), jnp.float32)),
        grid_spec=pltpu.PrefetchScalarGridSpec(
            num_scalar_prefetch=0,
            grid=(N // nb,),
            in_specs=[
                pl.BlockSpec((nb, H, WC_in), lambda n: (n, 0, 0)),     # acts
                pl.BlockSpec((3, WC_in, WC_out), lambda n: (0, 0, 0)),  # weights (resident)
                pl.BlockSpec((1, WC_in), lambda n: (0, 0)),            # pre-act scale
                pl.BlockSpec((1, WC_in), lambda n: (0, 0)),            # pre-act shift
            ],
            out_specs=(
                pl.BlockSpec((nb, H, WC_out), lambda n: (n, 0, 0)),    # conv output
                pl.BlockSpec((2, WC_out), lambda n: (0, 0)),           # BN stats
            ),
            scratch_shapes=[
                pltpu.VMEM((nb, H + 2, WC_in), jnp.bfloat16),          # padded acts
                pltpu.VMEM((2, WC_out), jnp.float32),                  # stats accumulator
            ],
        ),
        # Batch axis carries the global BN-stat reduction -> "arbitrary".
        compiler_params=pltpu.CompilerParams(dimension_semantics=("arbitrary",)),
    )(x_ld, w_toe, scale_t, shift_t)


# --------------------------------------------------------------------------
# Host-side glue.
# --------------------------------------------------------------------------
def _toeplitz_weights(w_oihw, W):
    """OIHW (C_out, C_in, 3, 3) -> (3, W*C_in, W*C_out) bf16 row-Toeplitz mats.

    B[dy, wi*C_in + ci, w*C_out + co] = w[co, ci, dy, wi - w + 1] when the tap
    is in range, else 0 -- i.e. the width-direction 3-tap stencil (including
    the pad=1 zero columns) is folded into the weight matrix.
    """
    c_out, c_in = int(w_oihw.shape[0]), int(w_oihw.shape[1])
    eye = np.zeros((3, W, W), np.float32)
    for dx in range(3):
        for w in range(W):
            wi = w + dx - 1
            if 0 <= wi < W:
                eye[dx, wi, w] = 1.0
    w_t = jnp.transpose(w_oihw, (2, 3, 1, 0))          # (ky, kx, C_in, C_out)
    toe = jnp.einsum("xiw,yxco->yicwo", jnp.asarray(eye), w_t)
    return toe.reshape(3, W * c_in, W * c_out).astype(jnp.bfloat16)


def _bn_scale_shift(stats_ld, gamma, beta, count, eps, W, C):
    """Per-lane (W*C) sums -> per-channel training-mode BN scale/shift."""
    s = stats_ld.reshape(2, W, C).sum(axis=1)          # reduce lane groups
    mean = s[0] / count
    var = s[1] / count - mean * mean                   # biased (training) var
    scale = gamma * jax.lax.rsqrt(var + eps)
    shift = beta - mean * scale
    return (scale.reshape(1, C).astype(jnp.float32),
            shift.reshape(1, C).astype(jnp.float32))


def two_con_forward(x_nchw, params, eps=1e-5):
    # NCHW -> NHWC -> lane-dense (N, H, W*C): done exactly once (free reshapes).
    x = jnp.transpose(x_nchw, (0, 2, 3, 1)).astype(jnp.float32)
    N, H, W, C0 = x.shape
    C1 = params["w1"].shape[0]
    count = N * H * W

    w1 = _toeplitz_weights(params["w1"], W)
    w2 = _toeplitz_weights(params["w2"], W)
    # NOTE: conv biases b1/b2 are exactly absorbed by the training-mode BN that
    # immediately follows (the batch mean shifts by the bias), so they are
    # deliberately not added in the kernels.  Forward output is unchanged.

    x_ld = x.reshape(N, H, W * C0)

    # Stage 1: conv1 + BN1 statistics.  Intermediate y1 stored bf16 (one HBM
    # round trip at half the bytes).
    ones0 = jnp.ones((1, W * C0), jnp.float32)
    zeros0 = jnp.zeros((1, W * C0), jnp.float32)
    y1, stats1 = conv3x3_bn_stats(x_ld, w1, ones0, zeros0, apply_pre_act=False,
                                  H=H, W=W, C_in=C0, C_out=C1,
                                  out_dtype=jnp.bfloat16)
    scale1, shift1 = _bn_scale_shift(stats1, params["gamma1"], params["beta1"],
                                     count, eps, W, C1)
    scale1_t = jnp.tile(scale1, (1, W))                # per-channel -> per-lane
    shift1_t = jnp.tile(shift1, (1, W))

    # Stage 2: fused (BN1-apply + ReLU) -> conv2 + BN2 statistics.
    y2, stats2 = conv3x3_bn_stats(y1, w2, scale1_t, shift1_t, apply_pre_act=True,
                                  H=H, W=W, C_in=C1, C_out=C1,
                                  out_dtype=jnp.float32)
    scale2, shift2 = _bn_scale_shift(stats2, params["gamma2"], params["beta2"],
                                     count, eps, W, C1)

    # Final BN2-apply + ReLU + layout restore in plain jnp: XLA fuses these
    # into a single pass over y2 (no standalone elementwise Pallas kernel).
    y2 = y2.reshape(N, H, W, C1)
    out = jnp.maximum(y2 * scale2.reshape(1, 1, 1, C1)
                      + shift2.reshape(1, 1, 1, C1), 0.0)
    return jnp.transpose(out, (0, 3, 1, 2))            # back to NCHW


# --------------------------------------------------------------------------
# Pure-JAX reference (PyTorch semantics) for a sanity check.
# --------------------------------------------------------------------------
def _reference_forward(x_nchw, params, eps=1e-5):
    def conv(x, w, b):
        y = jax.lax.conv_general_dilated(
            x, jnp.transpose(w, (2, 3, 1, 0)), window_strides=(1, 1),
            padding="SAME", dimension_numbers=("NHWC", "HWIO", "NHWC"))
        return y + b.reshape(1, 1, 1, -1)

    def bn_relu(y, gamma, beta):
        mean = jnp.mean(y, axis=(0, 1, 2))
        var = jnp.mean(jnp.square(y - mean), axis=(0, 1, 2))
        return jnp.maximum((y - mean) * jax.lax.rsqrt(var + eps) * gamma + beta,
                           0.0)

    x = jnp.transpose(x_nchw, (0, 2, 3, 1))
    y = bn_relu(conv(x, params["w1"], params["b1"]),
                params["gamma1"], params["beta1"])
    y = bn_relu(conv(y, params["w2"], params["b2"]),
                params["gamma2"], params["beta2"])
    return jnp.transpose(y, (0, 3, 1, 2))


if __name__ == "__main__":
    key = jax.random.PRNGKey(0)
    ks = jax.random.split(key, 9)
    N, C_in, C_out, H, W = 2, 4, 8, 16, 16

    x = jax.random.normal(ks[0], (N, C_in, H, W), jnp.float32)
    params = dict(
        w1=0.2 * jax.random.normal(ks[1], (C_out, C_in, 3, 3), jnp.float32),
        b1=0.1 * jax.random.normal(ks[2], (C_out,), jnp.float32),
        gamma1=1.0 + 0.1 * jax.random.normal(ks[3], (C_out,), jnp.float32),
        beta1=0.1 * jax.random.normal(ks[4], (C_out,), jnp.float32),
        w2=0.2 * jax.random.normal(ks[5], (C_out, C_out, 3, 3), jnp.float32),
        b2=0.1 * jax.random.normal(ks[6], (C_out,), jnp.float32),
        gamma2=1.0 + 0.1 * jax.random.normal(ks[7], (C_out,), jnp.float32),
        beta2=0.1 * jax.random.normal(ks[8], (C_out,), jnp.float32),
    )

    fwd = jax.jit(two_con_forward)
    out = fwd(x, params)
    jax.block_until_ready(out)

    # Sanity check vs. f32 reference (bf16-MXU tolerance).
    ref = _reference_forward(x, params)
    max_err = float(jnp.max(jnp.abs(out - ref)))
    if max_err > 0.2:
        raise AssertionError(f"mismatch vs reference: max abs err {max_err}")

    print("KERNEL_OK")
</pallas_src>

<mosaic_0001>
module attributes {stable_mosaic.version = 11 : i64} {
  func.func @_conv3x3_bn_stats_kernel(%arg0: i32, %arg1: memref<2x16x64xf32, #tpu.memory_space<vmem>>, %arg2: memref<3x64x128xbf16, #tpu.memory_space<vmem>>, %arg3: memref<1x64xf32, #tpu.memory_space<vmem>>, %arg4: memref<1x64xf32, #tpu.memory_space<vmem>>, %arg5: memref<2x16x128xbf16, #tpu.memory_space<vmem>>, %arg6: memref<2x128xf32, #tpu.memory_space<vmem>>, %arg7: memref<2x18x64xbf16, #tpu.memory_space<vmem>>, %arg8: memref<2x128xf32, #tpu.memory_space<vmem>>) attributes {dimension_semantics = [#tpu.dimension_semantics<arbitrary>], iteration_bounds = array<i64: 1>, scalar_prefetch = 0 : i64, scratch_operands = 2 : i64, tpu.core_type = #tpu.core_type<tc>, window_params = [{transform_indices = @transform_0, window_bounds = array<i64: 2, 16, 64>}, {pipeline_mode = #tpu.pipeline_mode<synchronous>, transform_indices = @transform_1, window_bounds = array<i64: 3, 64, 128>}, {pipeline_mode = #tpu.pipeline_mode<synchronous>, transform_indices = @transform_2, window_bounds = array<i64: 1, 64>}, {pipeline_mode = #tpu.pipeline_mode<synchronous>, transform_indices = @transform_3, window_bounds = array<i64: 1, 64>}, {transform_indices = @transform_4, window_bounds = array<i64: 2, 16, 128>}, {pipeline_mode = #tpu.pipeline_mode<synchronous>, transform_indices = @transform_5, window_bounds = array<i64: 2, 128>}]} {
    %c0_i32 = arith.constant 0 : i32
    %0 = arith.cmpi eq, %arg0, %c0_i32 : i32
    %1 = arith.extui %0 : i1 to i32
    %c0_i32_0 = arith.constant 0 : i32
    %2 = arith.cmpi ne, %1, %c0_i32_0 : i32
    scf.if %2 {
      %cst_40 = arith.constant 0.000000e+00 : bf16
      %42 = vector.broadcast %cst_40 : bf16 to vector<2x18x64xbf16>
      %c0_41 = arith.constant 0 : index
      %c0_42 = arith.constant 0 : index
      %c0_43 = arith.constant 0 : index
      %43 = vector.load %arg7[%c0_41, %c0_42, %c0_43] : memref<2x18x64xbf16, #tpu.memory_space<vmem>>, vector<2x18x64xbf16>
      tpu.vector_store %arg7[%c0_41, %c0_42, %c0_43], %42 {strides = array<i32>} : memref<2x18x64xbf16, #tpu.memory_space<vmem>>, vector<2x18x64xbf16>,
      %cst_44 = arith.constant 0.000000e+00 : f32
      %44 = vector.broadcast %cst_44 : f32 to vector<2x128xf32>
      %c0_45 = arith.constant 0 : index
      %c0_46 = arith.constant 0 : index
      %45 = vector.load %arg8[%c0_45, %c0_46] : memref<2x128xf32, #tpu.memory_space<vmem>>, vector<2x128xf32>
      tpu.vector_store %arg8[%c0_45, %c0_46], %44 {strides = array<i32>} : memref<2x128xf32, #tpu.memory_space<vmem>>, vector<2x128xf32>,
    } else {
    }
    %c0 = arith.constant 0 : index
    %c0_1 = arith.constant 0 : index
    %c0_2 = arith.constant 0 : index
    %3 = vector.load %arg1[%c0, %c0_1, %c0_2] : memref<2x16x64xf32, #tpu.memory_space<vmem>>, vector<2x16x64xf32>
    %4 = arith.truncf %3 : vector<2x16x64xf32> to vector<2x16x64xbf16>
    %c0_3 = arith.constant 0 : index
    %c1 = arith.constant 1 : index
    %c0_4 = arith.constant 0 : index
    %5 = vector.load %arg7[%c0_3, %c1, %c0_4] : memref<2x18x64xbf16, #tpu.memory_space<vmem>>, vector<2x16x64xbf16>
    tpu.vector_store %arg7[%c0_3, %c1, %c0_4], %4 {strides = array<i32>} : memref<2x18x64xbf16, #tpu.memory_space<vmem>>, vector<2x16x64xbf16>,
    %cst = arith.constant 0.000000e+00 : f32
    %6 = vector.broadcast %cst : f32 to vector<32x128xf32>
    %c0_5 = arith.constant 0 : index
    %c0_6 = arith.constant 0 : index
    %c0_7 = arith.constant 0 : index
    %7 = vector.load %arg7[%c0_5, %c0_6, %c0_7] : memref<2x18x64xbf16, #tpu.memory_space<vmem>>, vector<2x16x64xbf16>
    %8 = vector.shape_cast %7 : vector<2x16x64xbf16> to vector<32x64xbf16>
    %c0_8 = arith.constant 0 : index
    %c0_9 = arith.constant 0 : index
    %c0_10 = arith.constant 0 : index
    %9 = vector.load %arg2[%c0_8, %c0_9, %c0_10] : memref<3x64x128xbf16, #tpu.memory_space<vmem>>, vector<1x64x128xbf16>
    %10 = vector.shape_cast %9 : vector<1x64x128xbf16> to vector<64x128xbf16>
    %cst_11 = arith.constant dense<0.000000e+00> : vector<32x128xf32>
    %11 = tpu.matmul %8, %10, %cst_11 {dimension_numbers = #tpu.dot_dimension_numbers<[1], [0], [0], [1], [0, 0, 1, 1], [], []>} : vector<32x64xbf16>, vector<64x128xbf16>, vector<32x128xf32> -> vector<32x128xf32>
    %12 = arith.addf %6, %11 : vector<32x128xf32>
    %c0_12 = arith.constant 0 : index
    %c1_13 = arith.constant 1 : index
    %c0_14 = arith.constant 0 : index
    %13 = vector.load %arg7[%c0_12, %c1_13, %c0_14] : memref<2x18x64xbf16, #tpu.memory_space<vmem>>, vector<2x16x64xbf16>
    %14 = vector.shape_cast %13 : vector<2x16x64xbf16> to vector<32x64xbf16>
    %c1_15 = arith.constant 1 : index
    %c0_16 = arith.constant 0 : index
    %c0_17 = arith.constant 0 : index
    %15 = vector.load %arg2[%c1_15, %c0_16, %c0_17] : memref<3x64x128xbf16, #tpu.memory_space<vmem>>, vector<1x64x128xbf16>
    %16 = vector.shape_cast %15 : vector<1x64x128xbf16> to vector<64x128xbf16>
    %cst_18 = arith.constant dense<0.000000e+00> : vector<32x128xf32>
    %17 = tpu.matmul %14, %16, %cst_18 {dimension_numbers = #tpu.dot_dimension_numbers<[1], [0], [0], [1], [0, 0, 1, 1], [], []>} : vector<32x64xbf16>, vector<64x128xbf16>, vector<32x128xf32> -> vector<32x128xf32>
    %18 = arith.addf %12, %17 : vector<32x128xf32>
    %c0_19 = arith.constant 0 : index
    %c2 = arith.constant 2 : index
    %c0_20 = arith.constant 0 : index
    %19 = vector.load %arg7[%c0_19, %c2, %c0_20] : memref<2x18x64xbf16, #tpu.memory_space<vmem>>, vector<2x16x64xbf16>
    %20 = vector.shape_cast %19 : vector<2x16x64xbf16> to vector<32x64xbf16>
    %c2_21 = arith.constant 2 : index
    %c0_22 = arith.constant 0 : index
    %c0_23 = arith.constant 0 : index
    %21 = vector.load %arg2[%c2_21, %c0_22, %c0_23] : memref<3x64x128xbf16, #tpu.memory_space<vmem>>, vector<1x64x128xbf16>
    %22 = vector.shape_cast %21 : vector<1x64x128xbf16> to vector<64x128xbf16>
    %cst_24 = arith.constant dense<0.000000e+00> : vector<32x128xf32>
    %23 = tpu.matmul %20, %22, %cst_24 {dimension_numbers = #tpu.dot_dimension_numbers<[1], [0], [0], [1], [0, 0, 1, 1], [], []>} : vector<32x64xbf16>, vector<64x128xbf16>, vector<32x128xf32> -> vector<32x128xf32>
    %24 = arith.addf %18, %23 : vector<32x128xf32>
    %25 = vector.shape_cast %24 : vector<32x128xf32> to vector<2x16x128xf32>
    %26 = arith.truncf %25 : vector<2x16x128xf32> to vector<2x16x128xbf16>
    %c0_25 = arith.constant 0 : index
    %c0_26 = arith.constant 0 : index
    %c0_27 = arith.constant 0 : index
    %27 = vector.load %arg5[%c0_25, %c0_26, %c0_27] : memref<2x16x128xbf16, #tpu.memory_space<vmem>>, vector<2x16x128xbf16>
    tpu.vector_store %arg5[%c0_25, %c0_26, %c0_27], %26 {strides = array<i32>} : memref<2x16x128xbf16, #tpu.memory_space<vmem>>, vector<2x16x128xbf16>,
    %c0_28 = arith.constant 0 : index
    %c0_29 = arith.constant 0 : index
    %28 = vector.load %arg8[%c0_28, %c0_29] : memref<2x128xf32, #tpu.memory_space<vmem>>, vector<1x128xf32>
    %cst_30 = arith.constant dense<0.000000e+00> : vector<128xf32>
    %29 = vector.multi_reduction <add>, %24, %cst_30 [0] : vector<32x128xf32> to vector<128xf32>
    %30 = vector.shape_cast %29 : vector<128xf32> to vector<1x128xf32>
    %31 = arith.addf %28, %30 : vector<1x128xf32>
    %c0_31 = arith.constant 0 : index
    %c0_32 = arith.constant 0 : index
    %32 = vector.load %arg8[%c0_31, %c0_32] : memref<2x128xf32, #tpu.memory_space<vmem>>, vector<1x128xf32>
    tpu.vector_store %arg8[%c0_31, %c0_32], %31 {strides = array<i32>} : memref<2x128xf32, #tpu.memory_space<vmem>>, vector<1x128xf32>,
    %c1_33 = arith.constant 1 : index
    %c0_34 = arith.constant 0 : index
    %33 = vector.load %arg8[%c1_33, %c0_34] : memref<2x128xf32, #tpu.memory_space<vmem>>, vector<1x128xf32>
    %34 = arith.mulf %24, %24 : vector<32x128xf32>
    %cst_35 = arith.constant dense<0.000000e+00> : vector<128xf32>
    %35 = vector.multi_reduction <add>, %34, %cst_35 [0] : vector<32x128xf32> to vector<128xf32>
    %36 = vector.shape_cast %35 : vector<128xf32> to vector<1x128xf32>
    %37 = arith.addf %33, %36 : vector<1x128xf32>
    %c1_36 = arith.constant 1 : index
    %c0_37 = arith.constant 0 : index
    %38 = vector.load %arg8[%c1_36, %c0_37] : memref<2x128xf32, #tpu.memory_space<vmem>>, vector<1x128xf32>
    tpu.vector_store %arg8[%c1_36, %c0_37], %37 {strides = array<i32>} : memref<2x128xf32, #tpu.memory_space<vmem>>, vector<1x128xf32>,
    %c0_i32_38 = arith.constant 0 : i32
    %39 = arith.cmpi eq, %arg0, %c0_i32_38 : i32
    %40 = arith.extui %39 : i1 to i32
    %c0_i32_39 = arith.constant 0 : i32
    %41 = arith.cmpi ne, %40, %c0_i32_39 : i32
    scf.if %41 {
      %c0_40 = arith.constant 0 : index
      %c0_41 = arith.constant 0 : index
      %42 = vector.load %arg8[%c0_40, %c0_41] : memref<2x128xf32, #tpu.memory_space<vmem>>, vector<2x128xf32>
      %c0_42 = arith.constant 0 : index
      %c0_43 = arith.constant 0 : index
      %43 = vector.load %arg6[%c0_42, %c0_43] : memref<2x128xf32, #tpu.memory_space<vmem>>, vector<2x128xf32>
      tpu.vector_store %arg6[%c0_42, %c0_43], %42 {strides = array<i32>} : memref<2x128xf32, #tpu.memory_space<vmem>>, vector<2x128xf32>,
    } else {
    }
    return
  }
  func.func @transform_0(%arg0: i32) -> (i32, i32, i32) {
    %c0_i32 = arith.constant 0 : i32
    %c0_i32_0 = arith.constant 0 : i32
    %c0_i32_1 = arith.constant 0 : i32
    return %arg0, %c0_i32, %c0_i32_0 : i32, i32, i32
  }
  func.func @transform_1(%arg0: i32) -> (i32, i32, i32) {
    %c0_i32 = arith.constant 0 : i32
    %c0_i32_0 = arith.constant 0 : i32
    %c0_i32_1 = arith.constant 0 : i32
    %c0_i32_2 = arith.constant 0 : i32
    return %c0_i32, %c0_i32_0, %c0_i32_1 : i32, i32, i32
  }
  func.func @transform_2(%arg0: i32) -> (i32, i32) {
    %c0_i32 = arith.constant 0 : i32
    %c0_i32_0 = arith.constant 0 : i32
    %c0_i32_1 = arith.constant 0 : i32
    return %c0_i32, %c0_i32_0 : i32, i32
  }
  func.func @transform_3(%arg0: i32) -> (i32, i32) {
    %c0_i32 = arith.constant 0 : i32
    %c0_i32_0 = arith.constant 0 : i32
    %c0_i32_1 = arith.constant 0 : i32
    return %c0_i32, %c0_i32_0 : i32, i32
  }
  func.func @transform_4(%arg0: i32) -> (i32, i32, i32) {
    %c0_i32 = arith.constant 0 : i32
    %c0_i32_0 = arith.constant 0 : i32
    %c0_i32_1 = arith.constant 0 : i32
    return %arg0, %c0_i32, %c0_i32_0 : i32, i32, i32
  }
  func.func @transform_5(%arg0: i32) -> (i32, i32) {
    %c0_i32 = arith.constant 0 : i32
    %c0_i32_0 = arith.constant 0 : i32
    %c0_i32_1 = arith.constant 0 : i32
    return %c0_i32, %c0_i32_0 : i32, i32
  }
}

module attributes {stable_mosaic.version = 11 : i64} {
  func.func @_conv3x3_bn_stats_kernel(%arg0: i32, %arg1: memref<2x16x128xbf16, #tpu.memory_space<vmem>>, %arg2: memref<3x128x128xbf16, #tpu.memory_space<vmem>>, %arg3: memref<1x128xf32, #tpu.memory_space<vmem>>, %arg4: memref<1x128xf32, #tpu.memory_space<vmem>>, %arg5: memref<2x16x128xf32, #tpu.memory_space<vmem>>, %arg6: memref<2x128xf32, #tpu.memory_space<vmem>>, %arg7: memref<2x18x128xbf16, #tpu.memory_space<vmem>>, %arg8: memref<2x128xf32, #tpu.memory_space<vmem>>) attributes {dimension_semantics = [#tpu.dimension_semantics<arbitrary>], iteration_bounds = array<i64: 1>, scalar_prefetch = 0 : i64, scratch_operands = 2 : i64, tpu.core_type = #tpu.core_type<tc>, window_params = [{transform_indices = @transform_0, window_bounds = array<i64: 2, 16, 128>}, {pipeline_mode = #tpu.pipeline_mode<synchronous>, transform_indices = @transform_1, window_bounds = array<i64: 3, 128, 128>}, {pipeline_mode = #tpu.pipeline_mode<synchronous>, transform_indices = @transform_2, window_bounds = array<i64: 1, 128>}, {pipeline_mode = #tpu.pipeline_mode<synchronous>, transform_indices = @transform_3, window_bounds = array<i64: 1, 128>}, {transform_indices = @transform_4, window_bounds = array<i64: 2, 16, 128>}, {pipeline_mode = #tpu.pipeline_mode<synchronous>, transform_indices = @transform_5, window_bounds = array<i64: 2, 128>}]} {
    %c0_i32 = arith.constant 0 : i32
    %0 = arith.cmpi eq, %arg0, %c0_i32 : i32
    %1 = arith.extui %0 : i1 to i32
    %c0_i32_0 = arith.constant 0 : i32
    %2 = arith.cmpi ne, %1, %c0_i32_0 : i32
    scf.if %2 {
      %cst_45 = arith.constant 0.000000e+00 : bf16
      %52 = vector.broadcast %cst_45 : bf16 to vector<2x18x128xbf16>
      %c0_46 = arith.constant 0 : index
      %c0_47 = arith.constant 0 : index
      %c0_48 = arith.constant 0 : index
      %53 = vector.load %arg7[%c0_46, %c0_47, %c0_48] : memref<2x18x128xbf16, #tpu.memory_space<vmem>>, vector<2x18x128xbf16>
      tpu.vector_store %arg7[%c0_46, %c0_47, %c0_48], %52 {strides = array<i32>} : memref<2x18x128xbf16, #tpu.memory_space<vmem>>, vector<2x18x128xbf16>,
      %cst_49 = arith.constant 0.000000e+00 : f32
      %54 = vector.broadcast %cst_49 : f32 to vector<2x128xf32>
      %c0_50 = arith.constant 0 : index
      %c0_51 = arith.constant 0 : index
      %55 = vector.load %arg8[%c0_50, %c0_51] : memref<2x128xf32, #tpu.memory_space<vmem>>, vector<2x128xf32>
      tpu.vector_store %arg8[%c0_50, %c0_51], %54 {strides = array<i32>} : memref<2x128xf32, #tpu.memory_space<vmem>>, vector<2x128xf32>,
    } else {
    }
    %c0 = arith.constant 0 : index
    %c0_1 = arith.constant 0 : index
    %c0_2 = arith.constant 0 : index
    %3 = vector.load %arg1[%c0, %c0_1, %c0_2] : memref<2x16x128xbf16, #tpu.memory_space<vmem>>, vector<2x16x128xbf16>
    %4 = arith.extf %3 : vector<2x16x128xbf16> to vector<2x16x128xf32>
    %c0_3 = arith.constant 0 : index
    %c0_4 = arith.constant 0 : index
    %5 = vector.load %arg3[%c0_3, %c0_4] : memref<1x128xf32, #tpu.memory_space<vmem>>, vector<1x128xf32>
    %6 = vector.shape_cast %5 : vector<1x128xf32> to vector<1x1x128xf32>
    %c0_5 = arith.constant 0 : index
    %c0_6 = arith.constant 0 : index
    %7 = vector.load %arg4[%c0_5, %c0_6] : memref<1x128xf32, #tpu.memory_space<vmem>>, vector<1x128xf32>
    %8 = vector.shape_cast %7 : vector<1x128xf32> to vector<1x1x128xf32>
    %9 = vector.broadcast %6 : vector<1x1x128xf32> to vector<2x16x128xf32>
    %10 = arith.mulf %4, %9 : vector<2x16x128xf32>
    %11 = vector.broadcast %8 : vector<1x1x128xf32> to vector<2x16x128xf32>
    %12 = arith.addf %10, %11 : vector<2x16x128xf32>
    %cst = arith.constant 0.000000e+00 : f32
    %13 = vector.broadcast %cst : f32 to vector<2x16x128xf32>
    %14 = arith.maximumf %12, %13 : vector<2x16x128xf32>
    %15 = arith.truncf %14 : vector<2x16x128xf32> to vector<2x16x128xbf16>
    %c0_7 = arith.constant 0 : index
    %c1 = arith.constant 1 : index
    %c0_8 = arith.constant 0 : index
    %16 = vector.load %arg7[%c0_7, %c1, %c0_8] : memref<2x18x128xbf16, #tpu.memory_space<vmem>>, vector<2x16x128xbf16>
    tpu.vector_store %arg7[%c0_7, %c1, %c0_8], %15 {strides = array<i32>} : memref<2x18x128xbf16, #tpu.memory_space<vmem>>, vector<2x16x128xbf16>,
    %cst_9 = arith.constant 0.000000e+00 : f32
    %17 = vector.broadcast %cst_9 : f32 to vector<32x128xf32>
    %c0_10 = arith.constant 0 : index
    %c0_11 = arith.constant 0 : index
    %c0_12 = arith.constant 0 : index
    %18 = vector.load %arg7[%c0_10, %c0_11, %c0_12] : memref<2x18x128xbf16, #tpu.memory_space<vmem>>, vector<2x16x128xbf16>
    %19 = vector.shape_cast %18 : vector<2x16x128xbf16> to vector<32x128xbf16>
    %c0_13 = arith.constant 0 : index
    %c0_14 = arith.constant 0 : index
    %c0_15 = arith.constant 0 : index
    %20 = vector.load %arg2[%c0_13, %c0_14, %c0_15] : memref<3x128x128xbf16, #tpu.memory_space<vmem>>, vector<1x128x128xbf16>
    %21 = vector.shape_cast %20 : vector<1x128x128xbf16> to vector<128x128xbf16>
    %cst_16 = arith.constant dense<0.000000e+00> : vector<32x128xf32>
    %22 = tpu.matmul %19, %21, %cst_16 {dimension_numbers = #tpu.dot_dimension_numbers<[1], [0], [0], [1], [0, 0, 1, 1], [], []>} : vector<32x128xbf16>, vector<128x128xbf16>, vector<32x128xf32> -> vector<32x128xf32>
    %23 = arith.addf %17, %22 : vector<32x128xf32>
    %c0_17 = arith.constant 0 : index
    %c1_18 = arith.constant 1 : index
    %c0_19 = arith.constant 0 : index
    %24 = vector.load %arg7[%c0_17, %c1_18, %c0_19] : memref<2x18x128xbf16, #tpu.memory_space<vmem>>, vector<2x16x128xbf16>
    %25 = vector.shape_cast %24 : vector<2x16x128xbf16> to vector<32x128xbf16>
    %c1_20 = arith.constant 1 : index
    %c0_21 = arith.constant 0 : index
    %c0_22 = arith.constant 0 : index
    %26 = vector.load %arg2[%c1_20, %c0_21, %c0_22] : memref<3x128x128xbf16, #tpu.memory_space<vmem>>, vector<1x128x128xbf16>
    %27 = vector.shape_cast %26 : vector<1x128x128xbf16> to vector<128x128xbf16>
    %cst_23 = arith.constant dense<0.000000e+00> : vector<32x128xf32>
    %28 = tpu.matmul %25, %27, %cst_23 {dimension_numbers = #tpu.dot_dimension_numbers<[1], [0], [0], [1], [0, 0, 1, 1], [], []>} : vector<32x128xbf16>, vector<128x128xbf16>, vector<32x128xf32> -> vector<32x128xf32>
    %29 = arith.addf %23, %28 : vector<32x128xf32>
    %c0_24 = arith.constant 0 : index
    %c2 = arith.constant 2 : index
    %c0_25 = arith.constant 0 : index
    %30 = vector.load %arg7[%c0_24, %c2, %c0_25] : memref<2x18x128xbf16, #tpu.memory_space<vmem>>, vector<2x16x128xbf16>
    %31 = vector.shape_cast %30 : vector<2x16x128xbf16> to vector<32x128xbf16>
    %c2_26 = arith.constant 2 : index
    %c0_27 = arith.constant 0 : index
    %c0_28 = arith.constant 0 : index
    %32 = vector.load %arg2[%c2_26, %c0_27, %c0_28] : memref<3x128x128xbf16, #tpu.memory_space<vmem>>, vector<1x128x128xbf16>
    %33 = vector.shape_cast %32 : vector<1x128x128xbf16> to vector<128x128xbf16>
    %cst_29 = arith.constant dense<0.000000e+00> : vector<32x128xf32>
    %34 = tpu.matmul %31, %33, %cst_29 {dimension_numbers = #tpu.dot_dimension_numbers<[1], [0], [0], [1], [0, 0, 1, 1], [], []>} : vector<32x128xbf16>, vector<128x128xbf16>, vector<32x128xf32> -> vector<32x128xf32>
    %35 = arith.addf %29, %34 : vector<32x128xf32>
    %36 = vector.shape_cast %35 : vector<32x128xf32> to vector<2x16x128xf32>
    %c0_30 = arith.constant 0 : index
    %c0_31 = arith.constant 0 : index
    %c0_32 = arith.constant 0 : index
    %37 = vector.load %arg5[%c0_30, %c0_31, %c0_32] : memref<2x16x128xf32, #tpu.memory_space<vmem>>, vector<2x16x128xf32>
    tpu.vector_store %arg5[%c0_30, %c0_31, %c0_32], %36 {strides = array<i32>} : memref<2x16x128xf32, #tpu.memory_space<vmem>>, vector<2x16x128xf32>,
    %c0_33 = arith.constant 0 : index
    %c0_34 = arith.constant 0 : index
    %38 = vector.load %arg8[%c0_33, %c0_34] : memref<2x128xf32, #tpu.memory_space<vmem>>, vector<1x128xf32>
    %cst_35 = arith.constant dense<0.000000e+00> : vector<128xf32>
    %39 = vector.multi_reduction <add>, %35, %cst_35 [0] : vector<32x128xf32> to vector<128xf32>
    %40 = vector.shape_cast %39 : vector<128xf32> to vector<1x128xf32>
    %41 = arith.addf %38, %40 : vector<1x128xf32>
    %c0_36 = arith.constant 0 : index
    %c0_37 = arith.constant 0 : index
    %42 = vector.load %arg8[%c0_36, %c0_37] : memref<2x128xf32, #tpu.memory_space<vmem>>, vector<1x128xf32>
    tpu.vector_store %arg8[%c0_36, %c0_37], %41 {strides = array<i32>} : memref<2x128xf32, #tpu.memory_space<vmem>>, vector<1x128xf32>,
    %c1_38 = arith.constant 1 : index
    %c0_39 = arith.constant 0 : index
    %43 = vector.load %arg8[%c1_38, %c0_39] : memref<2x128xf32, #tpu.memory_space<vmem>>, vector<1x128xf32>
    %44 = arith.mulf %35, %35 : vector<32x128xf32>
    %cst_40 = arith.constant dense<0.000000e+00> : vector<128xf32>
    %45 = vector.multi_reduction <add>, %44, %cst_40 [0] : vector<32x128xf32> to vector<128xf32>
    %46 = vector.shape_cast %45 : vector<128xf32> to vector<1x128xf32>
    %47 = arith.addf %43, %46 : vector<1x128xf32>
    %c1_41 = arith.constant 1 : index
    %c0_42 = arith.constant 0 : index
    %48 = vector.load %arg8[%c1_41, %c0_42] : memref<2x128xf32, #tpu.memory_space<vmem>>, vector<1x128xf32>
    tpu.vector_store %arg8[%c1_41, %c0_42], %47 {strides = array<i32>} : memref<2x128xf32, #tpu.memory_space<vmem>>, vector<1x128xf32>,
    %c0_i32_43 = arith.constant 0 : i32
    %49 = arith.cmpi eq, %arg0, %c0_i32_43 : i32
    %50 = arith.extui %49 : i1 to i32
    %c0_i32_44 = arith.constant 0 : i32
    %51 = arith.cmpi ne, %50, %c0_i32_44 : i32
    scf.if %51 {
      %c0_45 = arith.constant 0 : index
      %c0_46 = arith.constant 0 : index
      %52 = vector.load %arg8[%c0_45, %c0_46] : memref<2x128xf32, #tpu.memory_space<vmem>>, vector<2x128xf32>
      %c0_47 = arith.constant 0 : index
      %c0_48 = arith.constant 0 : index
      %53 = vector.load %arg6[%c0_47, %c0_48] : memref<2x128xf32, #tpu.memory_space<vmem>>, vector<2x128xf32>
      tpu.vector_store %arg6[%c0_47, %c0_48], %52 {strides = array<i32>} : memref<2x128xf32, #tpu.memory_space<vmem>>, vector<2x128xf32>,
    } else {
    }
    return
  }
  func.func @transform_0(%arg0: i32) -> (i32, i32, i32) {
    %c0_i32 = arith.constant 0 : i32
    %c0_i32_0 = arith.constant 0 : i32
    %c0_i32_1 = arith.constant 0 : i32
    return %arg0, %c0_i32, %c0_i32_0 : i32, i32, i32
  }
  func.func @transform_1(%arg0: i32) -> (i32, i32, i32) {
    %c0_i32 = arith.constant 0 : i32
    %c0_i32_0 = arith.constant 0 : i32
    %c0_i32_1 = arith.constant 0 : i32
    %c0_i32_2 = arith.constant 0 : i32
    return %c0_i32, %c0_i32_0, %c0_i32_1 : i32, i32, i32
  }
  func.func @transform_2(%arg0: i32) -> (i32, i32) {
    %c0_i32 = arith.constant 0 : i32
    %c0_i32_0 = arith.constant 0 : i32
    %c0_i32_1 = arith.constant 0 : i32
    return %c0_i32, %c0_i32_0 : i32, i32
  }
  func.func @transform_3(%arg0: i32) -> (i32, i32) {
    %c0_i32 = arith.constant 0 : i32
    %c0_i32_0 = arith.constant 0 : i32
    %c0_i32_1 = arith.constant 0 : i32
    return %c0_i32, %c0_i32_0 : i32, i32
  }
  func.func @transform_4(%arg0: i32) -> (i32, i32, i32) {
    %c0_i32 = arith.constant 0 : i32
    %c0_i32_0 = arith.constant 0 : i32
    %c0_i32_1 = arith.constant 0 : i32
    return %arg0, %c0_i32, %c0_i32_0 : i32, i32, i32
  }
  func.func @transform_5(%arg0: i32) -> (i32, i32) {
    %c0_i32 = arith.constant 0 : i32
    %c0_i32_0 = arith.constant 0 : i32
    %c0_i32_1 = arith.constant 0 : i32
    return %c0_i32, %c0_i32_0 : i32, i32
  }
}

</mosaic_0001>

<bundles_post_ra>
// kernel: two_con_forward.2
= control target key start
LH: loop header
LB: loop body
LE: loop exit
PB: predicated region body
PF: predicated region fallthrough
CT: control target
= control target key end

     0   :  { %vm24_vm0 = vcmask 519168   ;;  %vm27_vm1 = vcmask 516096   ;;  %v690_v1 = vmov 0   ;;  %vm49_vm2 = vsmask.f32 256  ;;  %s854_s1 = inlined_call_operand.vmem [shape: bf16[3,64,128], index: 1, kind: input, shape index: {}]   ;;  %s855_s2 = inlined_call_operand.vmem [shape: f32[1,64], index: 2, kind: input, shape index: {}]   ;;  %s856_s3 = inlined_call_operand.vmem [shape: f32[1,64], index: 3, kind: input, shape index: {}]   ;;  %s857_s0 = inlined_call_operand.vmem [shape: f32[2,16,64], index: 0, kind: input, shape index: {}]   ;;  %s858_s4 = inlined_call_operand.vmem [shape: bf16[2,16,128], index: 4, kind: output, shape index: {0}]   ;;  %s859_s5 = inlined_call_operand.vmem [shape: f32[2,128], index: 5, kind: output, shape index: {1}]  }
   0x1   :  { %v676_v0 = vld [vmem:[%s854_s1] sm:$0xff]   ;;  %25 = vst.msk [vmem:[#allocation2] sm:$0xf] %vm24_vm0, %v690_v1  ;;  %26 = vst.msk [vmem:[#allocation2 + $0x4] sm:$0xf] %vm24_vm0, %v690_v1  ;;  %v677_v2 = vld [vmem:[%s854_s1 + $0x8] sm:$0xff]  }
   0x2   :  { %29 = vst.msk [vmem:[#allocation2 + $0xc] sm:$0xf] %vm24_vm0, %v690_v1  ;;  %30 = vst.msk [vmem:[#allocation2 + $0x10] sm:$0xf] %vm24_vm0, %v690_v1  ;;  %642 = vmatprep.subr.bf16.mxu0 %v676_v0  ;;  %v678_v3 = vld [vmem:[%s854_s1 + $0x10] sm:$0xff]   ;;  %v680_v4 = vld [vmem:[%s854_s1 + $0x20] sm:$0xff]  }
   0x3   :  { %31 = vst.msk [vmem:[#allocation2 + $0x14] sm:$0x1] %vm27_vm1, %v690_v1  ;;  %28 = vst.msk [vmem:[#allocation2 + $0x8] sm:$0x1] %vm27_vm1, %v690_v1  ;;  %643 = vmatpush3.bf16.msra.mxu0 %v676_v0  ;;  %v33_v5 = vld [vmem:[%s857_s0] sm:$0xff]  ;;  %v34_v6 = vld [vmem:[%s857_s0 + $0x8] sm:$0xff]  ;;  %630 = vmatprep.subr.bf16.mxu1 %v680_v4 }
   0x4   :  { %644 = vmatprep.subr.bf16.mxu0 %v677_v2  ;;  %v35_v7 = vld [vmem:[%s857_s0 + $0x10] sm:$0xff]  ;;  %v36_v8 = vld [vmem:[%s857_s0 + $0x18] sm:$0xff]  ;;  %v593_v9 = vpack.c.bf16 %v33_v5, %v33_v5  ;;  %v594_v10 = vpack.c.bf16 %v34_v6, %v34_v6  ;;  %vm50_vm3 = vsmask.f32 4368  ;;  %631 = vmatpush3.bf16.msra.mxu1 %v680_v4  ;;  %vm93_vm4 = vsmask.f32 7938  ;;  %vm771_vm7 = vmand %vm27_vm1, %vm49_vm2 }
   0x5   :  { %v595_v11 = vpack.c.bf16 %v35_v7, %v35_v7  ;;  %v596_v12 = vpack.c.bf16 %v36_v8, %v36_v8  ;;  %v679_v13 = vld [vmem:[%s854_s1 + $0x18] sm:$0xff]   ;;  %vm756_vm5 = vmor %vm49_vm2, %vm50_vm3  ;;  %v683_v29 = vld [vmem:[%s854_s1 + $0x28] sm:$0xff]   ;;  %vm216_vm8 = vcmask 523264   ;;  %vm126_vm9 = vsmask.f32 3328 }
   0x6   :  { %v53_v14 = vshrl.u32 %v593_v9, 16  ;;  %v56_v15 = vshll.u32 %v593_v9, 16  ;;  %v61_v16 = vshrl.u32 %v594_v10, 16  ;;  %v64_v17 = vshll.u32 %v594_v10, 16  ;;  %vm762_vm6 = vmand %vm24_vm0, %vm93_vm4  ;;  %v778_v36 = vld [vmem:[%s854_s1 + $0x40] sm:$0xff]   ;;  %632 = vmatprep.subr.bf16.mxu1 %v683_v29  ;;  %v686_v41 = vld [vmem:[%s854_s1 + $0x30] sm:$0xff]  }
   0x7   :  { %645 = vmatpush3.bf16.msra.mxu0 %v677_v2  ;;  %v70_v19 = vshrl.u32 %v595_v11, 16  ;;  %v73_v20 = vshll.u32 %v595_v11, 16  ;;  %v78_v21 = vshrl.u32 %v596_v12, 16  ;;  %v81_v22 = vshll.u32 %v596_v12, 16  ;;  %v688_v47 = vld [vmem:[%s854_s1 + $0x38] sm:$0xff]  }
   0x8   :  { %646 = vmatprep.subr.bf16.mxu0 %v678_v3  ;;  %v95_v23 = vld [vmem:[#allocation2] sm:$0xf]  ;;  %v55_v24 = vrot.slane %v53_v14, 7  ;;  %v63_v25 = vrot.slane %v61_v16, 7  ;;  %633 = vmatpush3.bf16.msra.mxu1 %v683_v29  ;;  %vm367_vm10 = vcmask 1042432   ;;  %vm368_vm11 = vcmask 1046532  }
   0x9   :  { %v105_v27 = vld [vmem:[#allocation2 + $0xc] sm:$0xf]  ;;  %v72_v30 = vrot.slane %v70_v19, 7  ;;  %v80_v31 = vrot.slane %v78_v21, 7  ;;  %634 = vmatprep.subr.bf16.mxu1 %v686_v41  ;;  %vm127_vm12 = vsmask.f32 7440  ;;  %vm808_vm13 = vmor %vm367_vm10, %vm368_vm11 }
   0xa   :  { %v109_v28 = vld [vmem:[#allocation2 + $0x14] sm:$0x1]  ;;  %v58_v33 = vor.u32 %v56_v15, %v55_v24  ;;  %v59_v34 = vrot.slane %v55_v24, 4  ;;  %v66_v35 = vor.u32 %v64_v17, %v63_v25  ;;  %v68_v48 = vrot.slane %v63_v25, 4  ;;  %v102_v49 = vld [vmem:[#allocation2 + $0x8] sm:$0x1]  ;;  %vm815_vm14 = vmor %vm126_vm9, %vm127_vm12 }
   0xb   :  { %647 = vmatpush3.bf16.msra.mxu0 %v678_v3  ;;  %v75_v37 = vor.u32 %v73_v20, %v72_v30  ;;  %v76_v38 = vrot.slane %v72_v30, 4  ;;  %v83_v39 = vor.u32 %v81_v22, %v80_v31  ;;  %v85_v40 = vrot.slane %v80_v31, 4  ;;  %v685_v3 = vld [vmem:[%s854_s1 + $0x48] sm:$0xff]   ;;  %v687_v21 = vld [vmem:[%s854_s1 + $0x50] sm:$0xff]  }
   0xc   :  { %648 = vmatprep.subr.bf16.mxu0 %v679_v13  ;;  %v67_v42 = vsel %vm756_vm5, %v59_v34, %v66_v35  ;;  %v96_v43 = vsel %vm762_vm6, %v58_v33, %v95_v23  ;;  %635 = vmatpush3.bf16.msra.mxu1 %v686_v41  ;;  %v103_v50 = vsel %vm771_vm7, %v68_v48, %v102_v49 }
   0xd   :  { %v84_v44 = vsel %vm756_vm5, %v76_v38, %v83_v39  ;;  %97 = vst [vmem:[#allocation2] sm:$0xf] %v96_v43  ;;  %99 = vst.msk [vmem:[#allocation2 + $0x4] sm:$0xf] %vm24_vm0, %v67_v42  ;;  %v106_v45 = vsel %vm762_vm6, %v75_v37, %v105_v27  ;;  %v110_v46 = vsel %vm771_vm7, %v85_v40, %v109_v28  ;;  %636 = vmatprep.subr.bf16.mxu1 %v688_v47  ;;  %v689_v39 = vld [vmem:[%s854_s1 + $0x58] sm:$0xff]  }
   0xe   :  { %107 = vst [vmem:[#allocation2 + $0xc] sm:$0xf] %v106_v45  ;;  %111 = vst [vmem:[#allocation2 + $0x14] sm:$0x1] %v110_v46 }
   0xf   :  { %649 = vmatpush3.bf16.msra.mxu0 %v679_v13  ;;  %108 = vst.msk [vmem:[#allocation2 + $0x10] sm:$0xf] %vm24_vm0, %v84_v44  ;;  %104 = vst [vmem:[#allocation2 + $0x8] sm:$0x1] %v103_v50  ;;  %v691_v50 = vmov 0.0  }
  0x10   :  { %654 = vmatprep.subr.bf16.mxu0 %v778_v36  ;;  %637 = vmatpush3.bf16.msra.mxu1 %v688_v47  ;;  %32 = vst [vmem:[#allocation3] sm:$0x3] %v691_v50 }
  0x14   :  { %v112_v51 = vld [vmem:[#allocation2] sm:$0xf]  ;;  %v113_v52 = vld [vmem:[#allocation2 + $0x4] sm:$0xf] }
  0x15   :  { %v130_v53 = vshrl.u32 %v112_v51, 16  ;;  %v133_v54 = vshll.u32 %v112_v51, 16  ;;  %v143_v55 = vshrl.u32 %v113_v52, 16  ;;  %v563_v56 = vcombine.low %v112_v51, %v113_v52  ;;  %v114_v57 = vld [vmem:[#allocation2 + $0xc] sm:$0xf] }
  0x16   :  { %v372_v58 = vrot.slane %v113_v52, 5  ;;  %v115_v59 = vld [vmem:[#allocation2 + $0x10] sm:$0xf]  ;;  %v154_v60 = vshrl.u32 %v114_v57, 16  ;;  %v157_v61 = vshll.u32 %v114_v57, 16  ;;  %v139_v62 = vshll.u32 %v113_v52, 16 }
  0x17   :  { %v132_v63 = vrot.slane %v130_v53, 4  ;;  %v135_v0 = vrot.slane %v133_v54, 5  ;;  %650 = vmatprep.mubr.msk.bf16.mxu0 %vm216_vm8, %v563_v56  ;;  %v167_v1 = vshrl.u32 %v115_v59, 16  ;;  %v564_v2 = vcombine.low %v114_v57, %v115_v59  ;;  %v124_v4 = vld [vmem:[#allocation2 + $0x8] sm:$0x1] }
  0x18   :  { %v374_v5 = vrot.slane %v372_v58, 4  ;;  %v156_v6 = vrot.slane %v154_v60, 4  ;;  %v159_v7 = vrot.slane %v157_v61, 5  ;;  %v379_v8 = vrot.slane %v115_v59, 5  ;;  %v125_v9 = vld [vmem:[#allocation2 + $0x14] sm:$0x1] }
  0x19   :  { %651 = vmatmul.mubr.msk.bf16.vlgmr.msra.gmra.mrb[0].mxu0 %vm216_vm8, %v564_v2  ;;  %v136_v10 = vor.u32 %v135_v0, %v132_v63  ;;  %v141_v11 = vrot.slane %v139_v62, 5  ;;  %v145_v12 = vrot.slane %v143_v55, 4  ;;  %v149_v13 = vshll.u32 %v124_v4, 16  ;;  %v361_v14 = vld [vmem:[#allocation2] sm:$0xe] }
  0x1a   :  { %655 = vmatpush3.bf16.msra.mxu0 %v778_v36  ;;  %v375_v17 = vrot.slane %v124_v4, 5  ;;  %v160_v18 = vor.u32 %v159_v7, %v156_v6  ;;  %v163_v19 = vshll.u32 %v115_v59, 16  ;;  %v169_v20 = vrot.slane %v167_v1, 4  ;;  %v362_v26 = vld [vmem:[#allocation2 + $0xc] sm:$0xe] }
  0x1b   :  { %656 = vmatprep.subr.bf16.mxu0 %v685_v3  ;;  %v137_v22 = vrot.slane %v136_v10, 4  ;;  %v146_v23 = vor.u32 %v145_v12, %v141_v11  ;;  %v151_v24 = vrot.slane %v149_v13, 5  ;;  %v173_v25 = vshll.u32 %v125_v9, 16 }
  0x1c   :  { %v161_v27 = vrot.slane %v160_v18, 4  ;;  %v165_v28 = vrot.slane %v163_v19, 5  ;;  %v571_v29 = vrot.slane %v361_v14, 9  ;;  %v382_v32 = vrot.slane %v125_v9, 5 }
  0x1d   :  { %v142_v30 = vsel %vm815_vm14, %v137_v22, %v141_v11  ;;  %v147_v31 = vrot.slane %v146_v23, 4  ;;  %v376_v33 = vsel %vm808_vm13, %v374_v5, %v375_v17  ;;  %v175_v35 = vrot.slane %v173_v25, 5  ;;  %v514_v23 = vld [vmem:[#allocation3 + $0x1] sm:$0x1] }
  0x1e   :  { %657 = vmatpush3.bf16.msra.mxu0 %v685_v3  ;;  %v170_v34 = vor.u32 %v169_v20, %v165_v28  ;;  %v373_v36 = vsel %vm808_vm13, %v571_v29, %v372_v58  ;;  %v572_v37 = vrot.slane %v362_v26, 9  ;;  %v381_v41 = vrot.slane %v379_v8, 4  ;;  %v502_v20 = vld [vmem:[#allocation3] sm:$0x1] }
  0x1f   :  { %658 = vmatprep.subr.bf16.mxu0 %v687_v21  ;;  %v152_v38 = vsel %vm815_vm14, %v147_v31, %v151_v24  ;;  %v581_v40 = vcombine.low %v373_v36, %v376_v33  ;;  %v166_v43 = vsel %vm815_vm14, %v161_v27, %v165_v28 }
  0x20   :  { %v555_v42 = vcombine.low %v142_v30, %v152_v38  ;;  %v171_v44 = vrot.slane %v170_v34, 4  ;;  %v380_v46 = vsel %vm808_vm13, %v572_v37, %v379_v8  ;;  %v383_v47 = vsel %vm808_vm13, %v381_v41, %v382_v32 }
  0x21   :  { %662 = vmatprep.mubr.msk.bf16.mxu0 %vm216_vm8, %v581_v40  ;;  %v582_v49 = vcombine.low %v380_v46, %v383_v47 }
  0x22   :  { %659 = vmatpush3.bf16.msra.mxu0 %v687_v21  ;;  %638 = vmatprep.mubr.msk.bf16.mxu1 %vm216_vm8, %v555_v42  ;;  %v176_v45 = vsel %vm815_vm14, %v171_v44, %v175_v35 }
  0x23   :  { %660 = vmatprep.subr.bf16.mxu0 %v689_v39  ;;  %v556_v48 = vcombine.low %v166_v43, %v176_v45 }
  0x25   :  { %639 = vmatmul.mubr.msk.bf16.vlgmr.msra.gmra.mrb[0].mxu1 %vm216_vm8, %v556_v48 }
  0x26   :  { %661 = vmatpush3.bf16.msra.mxu0 %v689_v39 }
  0x29   :  { %663 = vmatmul.mubr.msk.bf16.vlgmr.msra.gmra.mrb[0].mxu0 %vm216_vm8, %v582_v49 }
  0xf8   :  { %v640_v51 = vpop.f32.mrb[0].mxu1 }
  0xf9   :  { %v257_v52 = vpop.f32.mrb[1].mxu1 }
  0xfa   :  { %v641_v53 = vpop.f32.mrb[2].mxu1 }
  0xfb   :  { %v260_v54 = vpop.f32.mrb[3].mxu1 }
  0xfc   :  { %v664_v55 = vpop.f32.mrb[0].mxu0 }
  0xfd   :  { %v666_v56 = vadd.f32 %v664_v55, %v640_v51  ;;  %v463_v57 = vpop.f32.mrb[1].mxu0 }
  0xfe   :  { %v667_v58 = vadd.f32 %v463_v57, %v257_v52  ;;  %v665_v59 = vpop.f32.mrb[2].mxu0 }
  0xff   :  { %v668_v60 = vadd.f32 %v665_v59, %v641_v53  ;;  %v466_v61 = vpop.f32.mrb[3].mxu0  ;;  %v517_v4 = vmul.f32 %v666_v56, %v666_v56 }
 0x100   :  { %v669_v62 = vadd.f32 %v466_v61, %v260_v54  ;;  %v515_v0 = vmul.f32 %v667_v58, %v667_v58 }
 0x101   :  { %v609_v63 = vpack.c.bf16 %v668_v60, %v666_v56  ;;  %v518_v7 = vmul.f32 %v668_v60, %v668_v60 }
 0x102   :  { %v604_v1 = vpack.c.bf16 %v669_v62, %v667_v58  ;;  %v503_v2 = vadd.f32 %v669_v62, %v667_v58  ;;  %v516_v3 = vmul.f32 %v669_v62, %v669_v62 }
 0x103   :  { %611 = vst [vmem:[%s858_s4 + $0x8] sm:$0xff] %v609_v63  }
 0x104   :  { %605 = vst [vmem:[%s858_s4] sm:$0xff] %v604_v1   ;;  %v504_v5 = vadd.f32 %v666_v56, %v503_v2  ;;  %v519_v6 = vadd.f32 %v516_v3, %v515_v0 }
 0x106   :  { %v505_v8 = vadd.f32 %v668_v60, %v504_v5  ;;  %v520_v9 = vadd.f32 %v519_v6, %v517_v4 }
 0x108   :  { %v506_v10 = vrot.slane %v505_v8, 4  ;;  %v521_v11 = vadd.f32 %v520_v9, %v518_v7 }
 0x10a   :  { %v507_v12 = vadd.f32 %v506_v10, %v505_v8  ;;  %v522_v13 = vrot.slane %v521_v11, 4 }
 0x10c   :  { %v508_v14 = vrot.slane %v507_v12, 2  ;;  %v523_v15 = vadd.f32 %v522_v13, %v521_v11 }
 0x10e   :  { %v509_v16 = vadd.f32 %v508_v14, %v507_v12  ;;  %v524_v17 = vrot.slane %v523_v15, 2 }
 0x110   :  { %v510_v18 = vrot.slane %v509_v16, 1  ;;  %v525_v19 = vadd.f32 %v524_v17, %v523_v15 }
 0x112   :  { %v511_v21 = vadd.f32 %v510_v18, %v509_v16  ;;  %v526_v22 = vrot.slane %v525_v19, 1 }
 0x114   :  { %v512_v24 = vadd.f32 %v511_v21, %v502_v20  ;;  %v527_v25 = vadd.f32 %v526_v22, %v525_v19 }
 0x116   :  { %513 = vst [vmem:[#allocation3] sm:$0x1] %v512_v24  ;;  %v528_v26 = vadd.f32 %v527_v25, %v514_v23 }
 0x118   :  { %529 = vst [vmem:[#allocation3 + $0x1] sm:$0x1] %v528_v26 }
 0x11f   :  { %v533_v27 = vld [vmem:[#allocation3] sm:$0x3] }
 0x120   :  { %534 = vst [vmem:[%s859_s5] sm:$0x3] %v533_v27 }

// kernel: two_con_forward.3
= control target key start
LH: loop header
LB: loop body
LE: loop exit
PB: predicated region body
PF: predicated region fallthrough
CT: control target
= control target key end

     0   :  { %v846_v1 = vmov 0   ;;  %vm77_vm0 = vsmask.f32 256  ;;  %vm78_vm1 = vsmask.f32 4368  ;;  %vm120_vm2 = vcmask 1043456   ;;  %s1045_s1 = inlined_call_operand.vmem [shape: bf16[3,128,128], index: 1, kind: input, shape index: {}]   ;;  %s1046_s0 = inlined_call_operand.vmem [shape: bf16[2,16,128], index: 0, kind: input, shape index: {}]   ;;  %s1047_s2 = inlined_call_operand.vmem [shape: f32[1,128], index: 2, kind: input, shape index: {}]   ;;  %s1048_s3 = inlined_call_operand.vmem [shape: f32[1,128], index: 3, kind: input, shape index: {}]   ;;  %s1049_s4 = inlined_call_operand.vmem [shape: f32[2,16,128], index: 4, kind: output, shape index: {0}]   ;;  %s1050_s5 = inlined_call_operand.vmem [shape: f32[2,128], index: 5, kind: output, shape index: {1}]  }
   0x1   :  { %v820_v0 = vld [vmem:[%s1045_s1] sm:$0xff]   ;;  %24 = vst [vmem:[#allocation2] sm:$0xf] %v846_v1  ;;  %25 = vst [vmem:[#allocation2 + $0x4] sm:$0xf] %v846_v1  ;;  %v821_v2 = vld [vmem:[%s1045_s1 + $0x8] sm:$0xff]  }
   0x2   :  { %29 = vst [vmem:[#allocation2 + $0x14] sm:$0x1] %v846_v1  ;;  %26 = vst [vmem:[#allocation2 + $0x8] sm:$0x1] %v846_v1  ;;  %770 = vmatprep.subr.bf16.mxu0 %v820_v0  ;;  %v822_v3 = vld [vmem:[%s1045_s1 + $0x10] sm:$0xff]   ;;  %v823_v4 = vld [vmem:[%s1045_s1 + $0x18] sm:$0xff]  }
   0x3   :  { %27 = vst [vmem:[#allocation2 + $0xc] sm:$0xf] %v846_v1  ;;  %28 = vst [vmem:[#allocation2 + $0x10] sm:$0xf] %v846_v1  ;;  %771 = vmatpush3.bf16.msra.mxu0 %v820_v0  ;;  %v828_v5 = vld [vmem:[%s1045_s1 + $0x40] sm:$0xff]   ;;  %v719_v7 = vld [vmem:[%s1046_s0 + $0x8] sm:$0xff]  }
   0x4   :  { %772 = vmatprep.subr.bf16.mxu0 %v821_v2  ;;  %v712_v6 = vld [vmem:[%s1046_s0] sm:$0xff]   ;;  %750 = vmatprep.subr.bf16.mxu1 %v828_v5  ;;  %v718_v11 = vunpack.c.h.bf16 %v719_v7  ;;  %v717_v12 = vunpack.c.l.bf16 %v719_v7  ;;  %v831_v19 = vld [vmem:[%s1045_s1 + $0x48] sm:$0xff]   ;;  %vm127_vm3 = vcmask 1040384   ;;  %v834_v29 = vld [vmem:[%s1045_s1 + $0x50] sm:$0xff]   ;;  %vm121_vm4 = vsmask.f32 7938 }
   0x5   :  { %v637_v8 = vld [vmem:[%s1047_s2] ss:$0 sm:$0xff]  ;;  %v713_v9 = vunpack.c.l.bf16 %v712_v6  ;;  %v714_v10 = vunpack.c.h.bf16 %v712_v6  ;;  %751 = vmatpush3.bf16.msra.mxu1 %v828_v5  ;;  %v825_v24 = vld [vmem:[%s1045_s1 + $0x28] sm:$0xff]   ;;  %v826_v30 = vld [vmem:[%s1045_s1 + $0x30] sm:$0xff]   ;;  %vm161_vm8 = vsmask.f32 3328 }
   0x6   :  { %v638_v13 = vld [vmem:[%s1048_s3] ss:$0 sm:$0xff]  ;;  %v50_v17 = vmul.f32 %v718_v11, %v637_v8  ;;  %v49_v18 = vmul.f32 %v717_v12, %v637_v8  ;;  %752 = vmatprep.subr.bf16.mxu1 %v831_v19  ;;  %v836_v35 = vld [vmem:[%s1045_s1 + $0x58] sm:$0xff]   ;;  %vm931_vm5 = vmor %vm77_vm0, %vm78_vm1  ;;  %vm162_vm9 = vsmask.f32 7440  ;;  %vm449_vm10 = vcmask 1042432  }
   0x7   :  { %773 = vmatpush3.bf16.msra.mxu0 %v821_v2  ;;  %v824_v14 = vld [vmem:[%s1045_s1 + $0x20] sm:$0xff]   ;;  %v47_v15 = vmul.f32 %v713_v9, %v637_v8  ;;  %v48_v16 = vmul.f32 %v714_v10, %v637_v8  ;;  %v827_v46 = vld [vmem:[%s1045_s1 + $0x38] sm:$0xff]   ;;  %vm937_vm6 = vmand %vm120_vm2, %vm121_vm4  ;;  %vm450_vm11 = vcmask 1046532  }
   0x8   :  { %774 = vmatprep.subr.bf16.mxu0 %v822_v3  ;;  %v60_v22 = vadd.f32 %v638_v13, %v50_v17  ;;  %v59_v23 = vadd.f32 %v638_v13, %v49_v18  ;;  %v123_v41 = vld [vmem:[#allocation2] sm:$0xf]  ;;  %vm943_vm7 = vmand %vm127_vm3, %vm77_vm0  ;;  %v840_v60 = vld [vmem:[%s1045_s1 + $0x68] sm:$0xff]  }
   0x9   :  { %v57_v20 = vadd.f32 %v638_v13, %v47_v15  ;;  %v58_v21 = vadd.f32 %v638_v13, %v48_v16  ;;  %753 = vmatpush3.bf16.msra.mxu1 %v831_v19  ;;  %v838_v45 = vld [vmem:[%s1045_s1 + $0x60] sm:$0xff]   ;;  %v136_v50 = vld [vmem:[#allocation2 + $0x14] sm:$0x1]  ;;  %v129_v7 = vld [vmem:[#allocation2 + $0x8] sm:$0x1] }
   0xa   :  { %v64_v27 = vmax.f32 %v60_v22, 0.0  ;;  %v63_v28 = vmax.f32 %v59_v23, 0.0  ;;  %754 = vmatprep.subr.bf16.mxu1 %v834_v29  ;;  %v132_v51 = vld [vmem:[#allocation2 + $0xc] sm:$0xf]  ;;  %v830_v6 = vld [vmem:[%s1045_s1 + $0x80] sm:$0xff]   ;;  %v842_v8 = vld [vmem:[%s1045_s1 + $0x70] sm:$0xff]  }
   0xb   :  { %775 = vmatpush3.bf16.msra.mxu0 %v822_v3  ;;  %v61_v25 = vmax.f32 %v57_v20, 0.0  ;;  %v62_v26 = vmax.f32 %v58_v21, 0.0  ;;  %v844_v10 = vld [vmem:[%s1045_s1 + $0x78] sm:$0xff]   ;;  %vm982_vm12 = vmor %vm161_vm8, %vm162_vm9 }
   0xc   :  { %776 = vmatprep.subr.bf16.mxu0 %v823_v4  ;;  %v710_v33 = vpack.c.bf16 %v64_v27, %v64_v27  ;;  %v709_v34 = vpack.c.bf16 %v63_v28, %v63_v28  ;;  %vm993_vm13 = vmor %vm449_vm10, %vm450_vm11 }
   0xd   :  { %v707_v31 = vpack.c.bf16 %v61_v25, %v61_v25  ;;  %v708_v32 = vpack.c.bf16 %v62_v26, %v62_v26  ;;  %755 = vmatpush3.bf16.msra.mxu1 %v834_v29  ;;  %v833_v26 = vld [vmem:[%s1045_s1 + $0x88] sm:$0xff]  }
   0xe   :  { %v106_v40 = vshrl.u32 %v710_v33, 16  ;;  %v98_v42 = vshrl.u32 %v709_v34, 16  ;;  %v101_v43 = vshll.u32 %v709_v34, 16  ;;  %v109_v44 = vshll.u32 %v710_v33, 16  ;;  %756 = vmatprep.subr.bf16.mxu1 %v836_v35 }
   0xf   :  { %777 = vmatpush3.bf16.msra.mxu0 %v823_v4  ;;  %v81_v36 = vshrl.u32 %v707_v31, 16  ;;  %v84_v37 = vshll.u32 %v707_v31, 16  ;;  %v89_v38 = vshrl.u32 %v708_v32, 16  ;;  %v92_v39 = vshll.u32 %v708_v32, 16 }
  0x10   :  { %778 = vmatprep.subr.bf16.mxu0 %v824_v14  ;;  %v108_v52 = vrot.slane %v106_v40, 7  ;;  %v100_v54 = vrot.slane %v98_v42, 7  ;;  %v835_v42 = vld [vmem:[%s1045_s1 + $0x90] sm:$0xff]  }
  0x11   :  { %v83_v48 = vrot.slane %v81_v36, 7  ;;  %v91_v49 = vrot.slane %v89_v38, 7  ;;  %757 = vmatpush3.bf16.msra.mxu1 %v836_v35 }
  0x12   :  { %v113_v61 = vrot.slane %v108_v52, 4  ;;  %v103_v62 = vor.u32 %v101_v43, %v100_v54  ;;  %v104_v63 = vrot.slane %v100_v54, 4  ;;  %v111_v0 = vor.u32 %v109_v44, %v108_v52  ;;  %758 = vmatprep.subr.bf16.mxu1 %v838_v45 }
  0x13   :  { %779 = vmatpush3.bf16.msra.mxu0 %v824_v14  ;;  %v86_v55 = vor.u32 %v84_v37, %v83_v48  ;;  %v87_v56 = vrot.slane %v83_v48, 4  ;;  %v94_v57 = vor.u32 %v92_v39, %v91_v49  ;;  %v96_v58 = vrot.slane %v91_v49, 4 }
  0x14   :  { %780 = vmatprep.subr.bf16.mxu0 %v825_v24  ;;  %v137_v3 = vsel %vm943_vm7, %v113_v61, %v136_v50  ;;  %v112_v4 = vsel %vm931_vm5, %v104_v63, %v111_v0  ;;  %v133_v5 = vsel %vm937_vm6, %v103_v62, %v132_v51 }
  0x15   :  { %v95_v1 = vsel %vm931_vm5, %v87_v56, %v94_v57  ;;  %v124_v2 = vsel %vm937_vm6, %v86_v55, %v123_v41  ;;  %138 = vst [vmem:[#allocation2 + $0x14] sm:$0x1] %v137_v3  ;;  %134 = vst [vmem:[#allocation2 + $0xc] sm:$0xf] %v133_v5  ;;  %759 = vmatpush3.bf16.msra.mxu1 %v838_v45  ;;  %v130_v9 = vsel %vm943_vm7, %v96_v58, %v129_v7  ;;  %v837_v57 = vld [vmem:[%s1045_s1 + $0x98] sm:$0xff]   ;;  %v841_v3 = vld [vmem:[%s1045_s1 + $0xa8] sm:$0xff]  }
  0x16   :  { %125 = vst [vmem:[#allocation2] sm:$0xf] %v124_v2  ;;  %126 = vst [vmem:[#allocation2 + $0x4] sm:$0xf] %v95_v1  ;;  %760 = vmatprep.subr.bf16.mxu1 %v840_v60  ;;  %v839_v1 = vld [vmem:[%s1045_s1 + $0xa0] sm:$0xff]   ;;  %v843_v5 = vld [vmem:[%s1045_s1 + $0xb0] sm:$0xff]  }
  0x17   :  { %781 = vmatpush3.bf16.msra.mxu0 %v825_v24  ;;  %135 = vst [vmem:[#allocation2 + $0x10] sm:$0xf] %v112_v4  ;;  %131 = vst [vmem:[#allocation2 + $0x8] sm:$0x1] %v130_v9 }
  0x18   :  { %782 = vmatprep.subr.bf16.mxu0 %v826_v30 }
  0x19   :  { %761 = vmatpush3.bf16.msra.mxu1 %v840_v60 }
  0x1a   :  { %762 = vmatprep.subr.bf16.mxu1 %v842_v8 }
  0x1b   :  { %783 = vmatpush3.bf16.msra.mxu0 %v826_v30 }
  0x1c   :  { %784 = vmatprep.subr.bf16.mxu0 %v827_v46  ;;  %v141_v17 = vld [vmem:[#allocation2 + $0xc] sm:$0xf]  ;;  %v978_v31 = vld [vmem:[#allocation2 + $0x14] sm:$0x1] }
  0x1d   :  { %v139_v11 = vld [vmem:[#allocation2] sm:$0xf]  ;;  %v140_v12 = vld [vmem:[#allocation2 + $0x4] sm:$0xf]  ;;  %v189_v19 = vshrl.u32 %v141_v17, 16  ;;  %v192_v20 = vshll.u32 %v141_v17, 16  ;;  %763 = vmatpush3.bf16.msra.mxu1 %v842_v8 }
  0x1e   :  { %v165_v13 = vshrl.u32 %v139_v11, 16  ;;  %v168_v14 = vshll.u32 %v139_v11, 16  ;;  %v178_v15 = vshrl.u32 %v140_v12, 16  ;;  %v669_v16 = vcombine.low %v139_v11, %v140_v12  ;;  %v971_v18 = vld [vmem:[#allocation2 + $0x10] sm:$0xf]  ;;  %764 = vmatprep.subr.bf16.mxu1 %v844_v10 }
  0x1f   :  { %785 = vmatpush3.bf16.msra.mxu0 %v827_v46  ;;  %v174_v21 = vshll.u32 %v140_v12, 16  ;;  %v202_v24 = vshrl.u32 %v971_v18, 16  ;;  %v670_v25 = vcombine.low %v141_v17, %v971_v18  ;;  %v159_v27 = vld [vmem:[#allocation2 + $0x8] sm:$0x1]  ;;  %v191_v28 = vrot.slane %v189_v19, 4 }
  0x20   :  { %790 = vmatprep.subr.bf16.mxu0 %v830_v6  ;;  %v167_v22 = vrot.slane %v165_v13, 4  ;;  %v170_v23 = vrot.slane %v168_v14, 5  ;;  %786 = vmatprep.mubr.bf16.mxu0 %v669_v16  ;;  %v194_v29 = vrot.slane %v192_v20, 5  ;;  %v454_v32 = vrot.slane %v140_v12, 5  ;;  %v443_v36 = vld [vmem:[#allocation2] sm:$0xe] }
  0x21   :  { %v176_v30 = vrot.slane %v174_v21, 5  ;;  %v180_v34 = vrot.slane %v178_v15, 4  ;;  %v184_v35 = vshll.u32 %v159_v27, 16  ;;  %765 = vmatpush3.bf16.msra.mxu1 %v844_v10  ;;  %v198_v39 = vshll.u32 %v971_v18, 16  ;;  %v845_v10 = vld [vmem:[%s1045_s1 + $0xb8] sm:$0xff]  }
  0x22   :  { %787 = vmatmul.mubr.bf16.vlgmr.msra.gmra.mrb[0].mxu0 %v670_v25  ;;  %v171_v33 = vor.u32 %v170_v23, %v167_v22  ;;  %v195_v38 = vor.u32 %v194_v29, %v191_v28  ;;  %v204_v40 = vrot.slane %v202_v24, 4  ;;  %v208_v41 = vshll.u32 %v978_v31, 16 }
  0x23   :  { %791 = vmatpush3.bf16.msra.mxu0 %v830_v6  ;;  %v181_v44 = vor.u32 %v180_v34, %v176_v30  ;;  %v186_v45 = vrot.slane %v184_v35, 5  ;;  %v457_v46 = vrot.slane %v159_v27, 5  ;;  %v200_v49 = vrot.slane %v198_v39, 5  ;;  %v444_v6 = vld [vmem:[#allocation2 + $0xc] sm:$0xe] }
  0x24   :  { %792 = vmatprep.subr.bf16.mxu0 %v833_v26  ;;  %v172_v43 = vrot.slane %v171_v33, 4  ;;  %v196_v48 = vrot.slane %v195_v38, 4  ;;  %v679_v50 = vrot.slane %v443_v36, 9  ;;  %v456_v53 = vrot.slane %v454_v32, 4 }
  0x25   :  { %v182_v52 = vrot.slane %v181_v44, 4  ;;  %v205_v54 = vor.u32 %v204_v40, %v200_v49  ;;  %v210_v55 = vrot.slane %v208_v41, 5  ;;  %v461_v4 = vrot.slane %v971_v18, 5 }
  0x26   :  { %v177_v51 = vsel %vm982_vm12, %v172_v43, %v176_v30  ;;  %v455_v56 = vsel %vm993_vm13, %v679_v50, %v454_v32  ;;  %v458_v59 = vsel %vm993_vm13, %v456_v53, %v457_v46  ;;  %v201_v61 = vsel %vm982_vm12, %v196_v48, %v200_v49 }
  0x27   :  { %793 = vmatpush3.bf16.msra.mxu0 %v833_v26  ;;  %v187_v58 = vsel %vm982_vm12, %v182_v52, %v186_v45  ;;  %v206_v62 = vrot.slane %v205_v54, 4  ;;  %v697_v63 = vcombine.low %v455_v56, %v458_v59  ;;  %v464_v7 = vrot.slane %v978_v31, 5 }
  0x28   :  { %794 = vmatprep.subr.bf16.mxu0 %v835_v42  ;;  %v659_v60 = vcombine.low %v177_v51, %v187_v58  ;;  %v680_v8 = vrot.slane %v444_v6, 9  ;;  %v463_v9 = vrot.slane %v461_v4, 4  ;;  %v847_v14 = vmov 0.0  }
  0x29   :  { %v211_v0 = vsel %vm982_vm12, %v206_v62, %v210_v55  ;;  %806 = vmatprep.mubr.bf16.mxu0 %v697_v63  ;;  %30 = vst [vmem:[#allocation3] sm:$0x3] %v847_v14 }
  0x2a   :  { %766 = vmatprep.mubr.bf16.mxu1 %v659_v60  ;;  %v660_v2 = vcombine.low %v201_v61, %v211_v0  ;;  %v462_v11 = vsel %vm993_vm13, %v680_v8, %v461_v4  ;;  %v465_v12 = vsel %vm993_vm13, %v463_v9, %v464_v7 }
  0x2b   :  { %795 = vmatpush3.bf16.msra.mxu0 %v835_v42  ;;  %v698_v13 = vcombine.low %v462_v11, %v465_v12 }
  0x2c   :  { %796 = vmatprep.subr.bf16.mxu0 %v837_v57  ;;  %767 = vmatmul.mubr.bf16.vlgmr.msra.gmra.mrb[0].mxu1 %v660_v2 }
  0x2f   :  { %797 = vmatpush3.bf16.msra.mxu0 %v837_v57 }
  0x30   :  { %798 = vmatprep.subr.bf16.mxu0 %v839_v1  ;;  %v596_v46 = vld [vmem:[#allocation3] sm:$0x1]  ;;  %v608_v49 = vld [vmem:[#allocation3 + $0x1] sm:$0x1] }
  0x33   :  { %799 = vmatpush3.bf16.msra.mxu0 %v839_v1 }
  0x34   :  { %800 = vmatprep.subr.bf16.mxu0 %v841_v3 }
  0x37   :  { %801 = vmatpush3.bf16.msra.mxu0 %v841_v3 }
  0x38   :  { %802 = vmatprep.subr.bf16.mxu0 %v843_v5 }
  0x3b   :  { %803 = vmatpush3.bf16.msra.mxu0 %v843_v5 }
  0x3c   :  { %804 = vmatprep.subr.bf16.mxu0 %v845_v10 }
  0x3f   :  { %805 = vmatpush3.bf16.msra.mxu0 %v845_v10 }
  0x42   :  { %807 = vmatmul.mubr.bf16.vlgmr.msra.gmra.mrb[0].mxu0 %v698_v13 }
  0xff   :  { %v768_v15 = vpop.f32.mrb[0].mxu1 }
 0x100   :  { %v319_v16 = vpop.f32.mrb[1].mxu1 }
 0x101   :  { %v769_v17 = vpop.f32.mrb[2].mxu1 }
 0x102   :  { %v322_v18 = vpop.f32.mrb[3].mxu1 }
 0x115   :  { %v808_v19 = vpop.f32.mrb[0].mxu0 }
 0x116   :  { %v810_v20 = vadd.f32 %v808_v19, %v768_v15  ;;  %v573_v21 = vpop.f32.mrb[1].mxu0 }
 0x117   :  { %v811_v22 = vadd.f32 %v573_v21, %v319_v16  ;;  %v809_v23 = vpop.f32.mrb[2].mxu0 }
 0x118   :  { %594 = vst [vmem:[%s1049_s4 + $0x10] sm:$0xff] %v810_v20  ;;  %v812_v24 = vadd.f32 %v809_v23, %v769_v17  ;;  %v576_v25 = vpop.f32.mrb[3].mxu0  ;;  %v611_v30 = vmul.f32 %v810_v20, %v810_v20 }
 0x119   :  { %592 = vst [vmem:[%s1049_s4] sm:$0xff] %v811_v22  ;;  %v813_v26 = vadd.f32 %v576_v25, %v322_v18  ;;  %v609_v27 = vmul.f32 %v811_v22, %v811_v22 }
 0x11a   :  { %595 = vst [vmem:[%s1049_s4 + $0x18] sm:$0xff] %v812_v24  ;;  %v612_v33 = vmul.f32 %v812_v24, %v812_v24 }
 0x11b   :  { %593 = vst [vmem:[%s1049_s4 + $0x8] sm:$0xff] %v813_v26  ;;  %v597_v28 = vadd.f32 %v813_v26, %v811_v22  ;;  %v610_v29 = vmul.f32 %v813_v26, %v813_v26 }
 0x11d   :  { %v598_v31 = vadd.f32 %v810_v20, %v597_v28  ;;  %v613_v32 = vadd.f32 %v610_v29, %v609_v27 }
 0x11f   :  { %v599_v34 = vadd.f32 %v812_v24, %v598_v31  ;;  %v614_v35 = vadd.f32 %v613_v32, %v611_v30 }
 0x121   :  { %v600_v36 = vrot.slane %v599_v34, 4  ;;  %v615_v37 = vadd.f32 %v614_v35, %v612_v33 }
 0x123   :  { %v601_v38 = vadd.f32 %v600_v36, %v599_v34  ;;  %v616_v39 = vrot.slane %v615_v37, 4 }
 0x125   :  { %v602_v40 = vrot.slane %v601_v38, 2  ;;  %v617_v41 = vadd.f32 %v616_v39, %v615_v37 }
 0x127   :  { %v603_v42 = vadd.f32 %v602_v40, %v601_v38  ;;  %v618_v43 = vrot.slane %v617_v41, 2 }
 0x129   :  { %v604_v44 = vrot.slane %v603_v42, 1  ;;  %v619_v45 = vadd.f32 %v618_v43, %v617_v41 }
 0x12b   :  { %v605_v47 = vadd.f32 %v604_v44, %v603_v42  ;;  %v620_v48 = vrot.slane %v619_v45, 1 }
 0x12d   :  { %v606_v50 = vadd.f32 %v605_v47, %v596_v46  ;;  %v621_v51 = vadd.f32 %v620_v48, %v619_v45 }
 0x12f   :  { %607 = vst [vmem:[#allocation3] sm:$0x1] %v606_v50  ;;  %v622_v52 = vadd.f32 %v621_v51, %v608_v49 }
 0x131   :  { %623 = vst [vmem:[#allocation3 + $0x1] sm:$0x1] %v622_v52 }
 0x138   :  { %v627_v53 = vld [vmem:[#allocation3] sm:$0x3] }
 0x139   :  { %628 = vst [vmem:[%s1050_s5] sm:$0x3] %v627_v53 }

</bundles_post_ra>
